<compile_context>
chip_gen: v5e
topology: v5e:2x2
jax: 0.10.0
libtpu: 0.0.40
codegen_flags: <defaults>
</compile_context>

<pallas_src>
import jax
import jax.numpy as jnp
from jax import lax
from jax.experimental import pallas as pl
from jax.experimental.pallas import tpu as pltpu

H = 32   # hidden_size
V = 64   # output_size (vocab)
S = 8    # encoder sequence length
T = 4    # decode steps fused into one pallas_call in the demo


def _sigmoid(x):
    # sigma(x) = 0.5 * (tanh(x / 2) + 1): tanh runs on the EUP slot, no VPU divide.
    return 0.5 * jnp.tanh(0.5 * x) + 0.5


def decoder_kernel(
    # scalar prefetch (SMEM)
    words_ref,      # (T,) int32 teacher-forced word ids
    # VMEM inputs (constant index_maps -> DMA'd once)
    emb_ref,        # (V, H)    embedding table
    hc0_ref,        # (1, 2H)   initial carry [h0 | ctx0]
    enc_ref,        # (S, H)    encoder outputs
    we4_ref,        # (H, 4H)   emb -> gate pre-acts, columns [r | z | n_x | 0]
    wg_ref,         # (2H, 4H)  fused gate weights, rows [h | ctx], cols [r|z|n_x|n_h]
    wo_ref,         # (2H, V)   output projection, rows [rnn_output | context]
    bias_ref,       # (2, 128)  rows: [gate bias (4H) | b_out (V)], zero padded
    # VMEM output
    out_ref,        # (T, OUT_W) packed [logp(V) | h(H) | ctx(H) | attn(S) | 0..]
    # VMEM scratch
    ge_sc,          # (T, 4H) precomputed embedding-side gate pre-activations
):
    hdim = enc_ref.shape[1]
    seq = enc_ref.shape[0]
    vocab = wo_ref.shape[1]
    nsteps = out_ref.shape[0]
    h4 = 4 * hdim
    out_w = out_ref.shape[1]

    def mm(a, b):
        return jnp.dot(a, b, preferred_element_type=jnp.float32)

    # ---- prologue (off the recurrent critical path) ---------------------------
    # Gather all T teacher-forced embedding rows, then one batched (T,H)x(H,4H)
    # matmul with the gate biases folded in.  Each step only reads row t.
    rows = [emb_ref[pl.ds(words_ref[i], 1), :] for i in range(nsteps)]
    emb_rows = jnp.concatenate(rows, axis=0)                  # (T, H)
    bias4 = bias_ref[0:1, 0:h4]                               # (1, 4H)
    ge_sc[...] = mm(emb_rows, we4_ref[...]) + bias4           # (T, 4H)

    b_out = bias_ref[1:2, 0:vocab]                            # (1, V)
    enc = enc_ref[...]                                        # (S, H)
    wg = wg_ref[...]                                          # (2H, 4H)
    wo = wo_ref[...]                                          # (2H, V)

    # ---- recurrence: carry [h | ctx] as a single (1, 2H) vreg value -----------
    def step(t, hc):
        # One fused MXU op gives all gate pre-activations as one 128-lane row:
        #   cols [0:H)=r, [H:2H)=z, [2H:3H)=n_x (input side), [3H:4H)=n_h+b_hn.
        g = mm(hc, wg) + ge_sc[pl.ds(t, 1), :]                # (1, 4H)
        r = _sigmoid(g[:, 0:hdim])
        z = _sigmoid(g[:, hdim:2 * hdim])
        n = jnp.tanh(g[:, 2 * hdim:3 * hdim] + r * g[:, 3 * hdim:4 * hdim])
        h = hc[:, 0:hdim]
        h_new = (1.0 - z) * n + z * h                         # (1, H) == rnn_output

        # Multiplicative attention: softmax_i( h_new . enc[i] ).  Exact divide
        # (no approx reciprocal) so no error feeds back into the recurrence.
        energies = lax.dot_general(h_new, enc, (((1,), (1,)), ((), ())),
                                   preferred_element_type=jnp.float32)   # (1, S)
        e_max = jnp.max(energies, axis=-1, keepdims=True)
        e_exp = jnp.exp(energies - e_max)
        attn = e_exp / jnp.sum(e_exp, axis=-1, keepdims=True)

        context = mm(attn, enc)                               # (1, H)

        # New carry [h_new | context]: feeds both the output projection now and
        # next step's fused gate matmul with no further lane shuffling.
        hc_new = jnp.concatenate([h_new, context], axis=-1)   # (1, 2H)

        # ---- epilogue (does not feed the recurrence; scheduler can overlap) ---
        logits = mm(hc_new, wo) + b_out                       # (1, V)
        l_max = jnp.max(logits, axis=-1, keepdims=True)
        shifted = logits - l_max
        logp = shifted - jnp.log(jnp.sum(jnp.exp(shifted), axis=-1, keepdims=True))

        parts = [logp, hc_new, attn]
        padw = out_w - (vocab + 2 * hdim + seq)
        if padw:
            parts.append(jnp.zeros((1, padw), jnp.float32))
        out_ref[pl.ds(t, 1), :] = jnp.concatenate(parts, axis=-1)
        return hc_new

    lax.fori_loop(0, nsteps, step, hc0_ref[...], unroll=True)


def init_params(key, hidden_size=H, output_size=V):
    """Deterministic synthetic parameters matching the nn.Module shapes."""
    ks = jax.random.split(key, 7)
    scale = 1.0 / jnp.sqrt(hidden_size)
    emb = jax.random.normal(ks[0], (output_size, hidden_size), jnp.float32) * 0.1
    w_ih = jax.random.uniform(ks[1], (3 * hidden_size, 2 * hidden_size), jnp.float32,
                              -scale, scale)
    w_hh = jax.random.uniform(ks[2], (3 * hidden_size, hidden_size), jnp.float32,
                              -scale, scale)
    b_ih = jax.random.uniform(ks[3], (3 * hidden_size,), jnp.float32, -scale, scale)
    b_hh = jax.random.uniform(ks[4], (3 * hidden_size,), jnp.float32, -scale, scale)
    w_out = jax.random.uniform(ks[5], (output_size, 2 * hidden_size), jnp.float32,
                               -scale, scale)
    b_out = jax.random.uniform(ks[6], (output_size,), jnp.float32, -scale, scale)
    return dict(emb=emb, w_ih=w_ih, w_hh=w_hh, b_ih=b_ih, b_hh=b_hh,
                w_out=w_out, b_out=b_out)


def _prep_weights(params):
    """Build the fused / transposed weight layout used by the kernel.

    - we4 (H, 4H): embedding -> gate pre-activations, columns [r | z | n_x | 0]
    - wg (2H, 4H): carry [h | ctx] -> gate pre-activations, columns
                   [r | z | n_x | n_h]; h rows carry Wh_r|Wh_z|0|Wh_n and ctx
                   rows carry Wc_r|Wc_z|Wc_n|0.
    - wo (2H, V):  output projection for rows [rnn_output | context].
    - bias (2, 128): row 0 = [b_ir+b_hr | b_iz+b_hz | b_in | b_hn], row 1 = b_out.
    All contractions stay <= 128 (optimal on every MXU generation at M=1).
    """
    hdim = params["emb"].shape[1]
    vocab = params["w_out"].shape[0]
    w_ih, w_hh = params["w_ih"], params["w_hh"]
    b_ih, b_hh = params["b_ih"], params["b_hh"]

    # Per-gate blocks (PyTorch GRU order r, z, n).
    Wi_r, Wi_z, Wi_n = w_ih[0:hdim], w_ih[hdim:2 * hdim], w_ih[2 * hdim:]     # (H, 2H)
    Wh_r, Wh_z, Wh_n = w_hh[0:hdim], w_hh[hdim:2 * hdim], w_hh[2 * hdim:]     # (H, H)

    # Embedding half of the input weights (x = [emb ; ctx]).
    We_r, We_z, We_n = Wi_r[:, :hdim].T, Wi_z[:, :hdim].T, Wi_n[:, :hdim].T   # (H, H)
    we4 = jnp.concatenate([We_r, We_z, We_n, jnp.zeros_like(We_n)], axis=1)   # (H, 4H)

    # Context half + hidden weights -> one fused (2H, 4H) gate matrix.
    Wc_r, Wc_z, Wc_n = Wi_r[:, hdim:].T, Wi_z[:, hdim:].T, Wi_n[:, hdim:].T   # (H, H)
    Whr, Whz, Whn = Wh_r.T, Wh_z.T, Wh_n.T                                    # (H, H)
    zeros = jnp.zeros((hdim, hdim), jnp.float32)
    wg = jnp.concatenate([
        jnp.concatenate([Whr, Whz, zeros, Whn], axis=1),    # h rows
        jnp.concatenate([Wc_r, Wc_z, Wc_n, zeros], axis=1),  # ctx rows
    ], axis=0)                                                                # (2H, 4H)

    wo = params["w_out"].T                                                    # (2H, V)

    b_ir, b_iz, b_in = b_ih[:hdim], b_ih[hdim:2 * hdim], b_ih[2 * hdim:]
    b_hr, b_hz, b_hn = b_hh[:hdim], b_hh[hdim:2 * hdim], b_hh[2 * hdim:]
    bias4 = jnp.concatenate([b_ir + b_hr, b_iz + b_hz, b_in, b_hn])           # (4H,)

    bw = ((max(4 * hdim, vocab) + 127) // 128) * 128

    def row(v):
        return jnp.pad(v, (0, bw - v.shape[0]))

    bias = jnp.stack([row(bias4), row(params["b_out"])])                      # (2, bw)
    return we4, wg, wo, bias


def mult_attn_decoder_steps(word_inputs, last_context, last_hidden,
                            encoder_outputs, params):
    """Run len(word_inputs) teacher-forced decode steps in ONE pallas_call
    (single kernel invocation, time loop folded into the body).

    word_inputs: (T,) int; last_context: (1, H); last_hidden: (1, 1, H);
    encoder_outputs: (S, 1, H).
    Returns per-step (log_probs (T,V), contexts (T,H), hiddens (T,H),
    attn_weights (T,S))."""
    hdim = last_context.shape[1]
    seq = encoder_outputs.shape[0]
    vocab = params["w_out"].shape[0]
    nsteps = word_inputs.shape[0]
    out_w = max(128, ((vocab + 2 * hdim + seq + 127) // 128) * 128)

    we4, wg, wo, bias = _prep_weights(params)
    enc2d = encoder_outputs.reshape(seq, hdim)
    hc0 = jnp.concatenate([last_hidden.reshape(1, hdim),
                           last_context.reshape(1, hdim)], axis=1)   # (1, 2H) [h|ctx]
    words = jnp.clip(word_inputs.astype(jnp.int32), 0, vocab - 1)    # OOB guard

    inputs = [params["emb"], hc0, enc2d, we4, wg, wo, bias]

    def const_spec(shape):
        return pl.BlockSpec(shape, lambda g, w: (0,) * len(shape))

    grid_spec = pltpu.PrefetchScalarGridSpec(
        num_scalar_prefetch=1,
        grid=(1,),   # single invocation; the T-step loop lives inside the kernel
        in_specs=[const_spec(a.shape) for a in inputs],
        out_specs=pl.BlockSpec((nsteps, out_w), lambda g, w: (0, 0)),
        scratch_shapes=[pltpu.VMEM((nsteps, 4 * hdim), jnp.float32)],
    )

    fn = pl.pallas_call(
        decoder_kernel,
        out_shape=jax.ShapeDtypeStruct((nsteps, out_w), jnp.float32),
        grid_spec=grid_spec,
        compiler_params=pltpu.CompilerParams(
            dimension_semantics=("arbitrary",)),
    )
    packed = fn(words, *inputs)                    # (T, out_w)

    logp = packed[:, 0:vocab]
    hid = packed[:, vocab:vocab + hdim]
    ctx = packed[:, vocab + hdim:vocab + 2 * hdim]
    attn = packed[:, vocab + 2 * hdim:vocab + 2 * hdim + seq]
    return logp, ctx, hid, attn


def mult_attn_decoder_forward(word_input, last_context, last_hidden,
                              encoder_outputs, params):
    """One decode step == MultAttnDecoderRNN.forward.
    Returns (output (1,V), context (1,H), hidden (1,1,H), attn (1,1,S))."""
    hdim = last_context.shape[1]
    seq = encoder_outputs.shape[0]
    logp, ctx, hid, attn = mult_attn_decoder_steps(
        jnp.reshape(word_input, (1,)), last_context, last_hidden,
        encoder_outputs, params)
    return logp, ctx, hid.reshape(1, 1, hdim), attn.reshape(1, 1, seq)


def reference_forward(word_input, last_context, last_hidden, encoder_outputs, params):
    """Pure-JAX reference for one decode step (PyTorch semantics)."""
    with jax.default_matmul_precision("float32"):
        hdim = last_context.shape[1]
        x = jnp.concatenate([params["emb"][word_input[0]], last_context[0]])
        h = last_hidden.reshape(hdim)
        gi = params["w_ih"] @ x + params["b_ih"]
        gh = params["w_hh"] @ h + params["b_hh"]
        r = jax.nn.sigmoid(gi[:hdim] + gh[:hdim])
        z = jax.nn.sigmoid(gi[hdim:2 * hdim] + gh[hdim:2 * hdim])
        n = jnp.tanh(gi[2 * hdim:] + r * gh[2 * hdim:])
        h_new = (1.0 - z) * n + z * h
        enc = encoder_outputs.reshape(-1, hdim)
        attn = jax.nn.softmax(enc @ h_new)
        context = attn @ enc
        logits = params["w_out"] @ jnp.concatenate([h_new, context]) + params["b_out"]
        logp = jax.nn.log_softmax(logits)
    return (logp[None, :], context[None, :],
            h_new.reshape(1, 1, hdim), attn.reshape(1, 1, -1))


if __name__ == "__main__":
    key = jax.random.PRNGKey(0)
    k_param, k_ctx, k_h, k_enc = jax.random.split(key, 4)

    params = init_params(k_param)

    word_input = jnp.array([5], dtype=jnp.int32)                        # token id
    last_context = jax.random.normal(k_ctx, (1, H), jnp.float32)        # (1, H)
    last_hidden = jax.random.normal(k_h, (1, 1, H), jnp.float32)        # (1, 1, H)
    encoder_outputs = jax.random.normal(k_enc, (S, 1, H), jnp.float32)  # (S, 1, H)

    # --- single decode step (== module forward) ---
    output, context, hidden, attn_weights = mult_attn_decoder_forward(
        word_input, last_context, last_hidden, encoder_outputs, params)
    jax.block_until_ready((output, context, hidden, attn_weights))

    assert output.shape == (1, V)
    assert context.shape == (1, H)
    assert hidden.shape == (1, 1, H)
    assert attn_weights.shape == (1, 1, S)
    assert bool(jnp.all(jnp.isfinite(output)))

    r_out, r_ctx, r_hid, r_attn = reference_forward(
        word_input, last_context, last_hidden, encoder_outputs, params)
    assert jnp.allclose(output, r_out, rtol=5e-2, atol=5e-2)
    assert jnp.allclose(context, r_ctx, rtol=5e-2, atol=5e-2)
    assert jnp.allclose(hidden, r_hid, rtol=5e-2, atol=5e-2)
    assert jnp.allclose(attn_weights, r_attn, rtol=5e-2, atol=5e-2)

    # --- T teacher-forced decode steps fused into ONE kernel invocation ---
    word_seq = jnp.array([5, 17, 3, 42], dtype=jnp.int32)               # (T,)
    lp_all, ctx_all, hid_all, attn_all = mult_attn_decoder_steps(
        word_seq, last_context, last_hidden, encoder_outputs, params)
    jax.block_until_ready((lp_all, ctx_all, hid_all, attn_all))

    assert lp_all.shape == (T, V) and attn_all.shape == (T, S)
    assert ctx_all.shape == (T, H) and hid_all.shape == (T, H)
    assert bool(jnp.all(jnp.isfinite(lp_all)))

    # Reference loop over the same teacher-forced sequence: validates the
    # vreg state carry (hidden/context) across the fused in-kernel steps.
    # (Exact softmax division in-kernel keeps the recurrence from accumulating
    # approximation error, so the multi-step tolerance is tightened vs. the
    # previous approx-reciprocal version.)
    ctx_r, hid_r = last_context, last_hidden
    for step in range(T):
        lp_r, ctx_r, hid_r, at_r = reference_forward(
            word_seq[step:step + 1], ctx_r, hid_r, encoder_outputs, params)
        assert jnp.allclose(lp_all[step], lp_r[0], rtol=5e-2, atol=5e-2)
        assert jnp.allclose(ctx_all[step], ctx_r[0], rtol=5e-2, atol=5e-2)
        assert jnp.allclose(hid_all[step], hid_r.reshape(-1), rtol=5e-2, atol=5e-2)
        assert jnp.allclose(attn_all[step], at_r.reshape(-1), rtol=5e-2, atol=5e-2)

    print("KERNEL_OK")
</pallas_src>

<mosaic_0001>
module attributes {stable_mosaic.version = 11 : i64} {
  func.func @decoder_kernel(%arg0: i32, %arg1: memref<1xi32, #tpu.memory_space<smem>>, %arg2: memref<64x32xf32, #tpu.memory_space<vmem>>, %arg3: memref<1x64xf32, #tpu.memory_space<vmem>>, %arg4: memref<8x32xf32, #tpu.memory_space<vmem>>, %arg5: memref<32x128xf32, #tpu.memory_space<vmem>>, %arg6: memref<64x128xf32, #tpu.memory_space<vmem>>, %arg7: memref<64x64xf32, #tpu.memory_space<vmem>>, %arg8: memref<2x128xf32, #tpu.memory_space<vmem>>, %arg9: memref<1x256xf32, #tpu.memory_space<vmem>>, %arg10: memref<1x128xf32, #tpu.memory_space<vmem>>) attributes {dimension_semantics = [#tpu.dimension_semantics<arbitrary>], iteration_bounds = array<i64: 1>, scalar_prefetch = 1 : i64, scratch_operands = 1 : i64, tpu.core_type = #tpu.core_type<tc>, window_params = [{pipeline_mode = #tpu.pipeline_mode<synchronous>, transform_indices = @transform_0, window_bounds = array<i64: 64, 32>}, {pipeline_mode = #tpu.pipeline_mode<synchronous>, transform_indices = @transform_1, window_bounds = array<i64: 1, 64>}, {pipeline_mode = #tpu.pipeline_mode<synchronous>, transform_indices = @transform_2, window_bounds = array<i64: 8, 32>}, {pipeline_mode = #tpu.pipeline_mode<synchronous>, transform_indices = @transform_3, window_bounds = array<i64: 32, 128>}, {pipeline_mode = #tpu.pipeline_mode<synchronous>, transform_indices = @transform_4, window_bounds = array<i64: 64, 128>}, {pipeline_mode = #tpu.pipeline_mode<synchronous>, transform_indices = @transform_5, window_bounds = array<i64: 64, 64>}, {pipeline_mode = #tpu.pipeline_mode<synchronous>, transform_indices = @transform_6, window_bounds = array<i64: 2, 128>}, {pipeline_mode = #tpu.pipeline_mode<synchronous>, transform_indices = @transform_7, window_bounds = array<i64: 1, 256>}]} {
    %c0 = arith.constant 0 : index
    %0 = memref.load %arg1[%c0] : memref<1xi32, #tpu.memory_space<smem>>
    %1 = arith.index_cast %0 : i32 to index
    %c0_0 = arith.constant 0 : index
    %2 = vector.load %arg2[%1, %c0_0] : memref<64x32xf32, #tpu.memory_space<vmem>>, vector<1x32xf32>
    %c0_1 = arith.constant 0 : index
    %c0_2 = arith.constant 0 : index
    %3 = vector.load %arg8[%c0_1, %c0_2] : memref<2x128xf32, #tpu.memory_space<vmem>>, vector<1x128xf32>
    %c0_3 = arith.constant 0 : index
    %c0_4 = arith.constant 0 : index
    %4 = vector.load %arg5[%c0_3, %c0_4] : memref<32x128xf32, #tpu.memory_space<vmem>>, vector<32x128xf32>
    %cst = arith.constant dense<0.000000e+00> : vector<1x128xf32>
    %5 = tpu.matmul %2, %4, %cst {dimension_numbers = #tpu.dot_dimension_numbers<[1], [0], [0], [1], [0, 0, 1, 1], [], []>} : vector<1x32xf32>, vector<32x128xf32>, vector<1x128xf32> -> vector<1x128xf32>
    %6 = arith.addf %5, %3 : vector<1x128xf32>
    %c0_5 = arith.constant 0 : index
    %c0_6 = arith.constant 0 : index
    %7 = vector.load %arg10[%c0_5, %c0_6] : memref<1x128xf32, #tpu.memory_space<vmem>>, vector<1x128xf32>
    tpu.vector_store %arg10[%c0_5, %c0_6], %6 {strides = array<i32>} : memref<1x128xf32, #tpu.memory_space<vmem>>, vector<1x128xf32>,
    %c1 = arith.constant 1 : index
    %c0_7 = arith.constant 0 : index
    %8 = vector.load %arg8[%c1, %c0_7] : memref<2x128xf32, #tpu.memory_space<vmem>>, vector<1x64xf32>
    %c0_8 = arith.constant 0 : index
    %c0_9 = arith.constant 0 : index
    %9 = vector.load %arg4[%c0_8, %c0_9] : memref<8x32xf32, #tpu.memory_space<vmem>>, vector<8x32xf32>
    %c0_10 = arith.constant 0 : index
    %c0_11 = arith.constant 0 : index
    %10 = vector.load %arg6[%c0_10, %c0_11] : memref<64x128xf32, #tpu.memory_space<vmem>>, vector<64x128xf32>
    %c0_12 = arith.constant 0 : index
    %c0_13 = arith.constant 0 : index
    %11 = vector.load %arg7[%c0_12, %c0_13] : memref<64x64xf32, #tpu.memory_space<vmem>>, vector<64x64xf32>
    %c0_14 = arith.constant 0 : index
    %c0_15 = arith.constant 0 : index
    %12 = vector.load %arg3[%c0_14, %c0_15] : memref<1x64xf32, #tpu.memory_space<vmem>>, vector<1x64xf32>
    %c0_i32 = arith.constant 0 : i32
    %cst_16 = arith.constant dense<0.000000e+00> : vector<1x128xf32>
    %13 = tpu.matmul %12, %10, %cst_16 {dimension_numbers = #tpu.dot_dimension_numbers<[1], [0], [0], [1], [0, 0, 1, 1], [], []>} : vector<1x64xf32>, vector<64x128xf32>, vector<1x128xf32> -> vector<1x128xf32>
    %14 = arith.index_cast %c0_i32 : i32 to index
    %c0_17 = arith.constant 0 : index
    %15 = vector.load %arg10[%14, %c0_17] : memref<1x128xf32, #tpu.memory_space<vmem>>, vector<1x128xf32>
    %16 = arith.addf %13, %15 : vector<1x128xf32>
    %17 = vector.extract_strided_slice %16 {offsets = [0, 0], sizes = [1, 32], strides = [1, 1]} : vector<1x128xf32> to vector<1x32xf32>
    %cst_18 = arith.constant 5.000000e-01 : f32
    %18 = vector.broadcast %cst_18 : f32 to vector<1x32xf32>
    %19 = arith.mulf %18, %17 : vector<1x32xf32>
    %20 = math.tanh %19 : vector<1x32xf32>
    %cst_19 = arith.constant 5.000000e-01 : f32
    %21 = vector.broadcast %cst_19 : f32 to vector<1x32xf32>
    %22 = arith.mulf %21, %20 : vector<1x32xf32>
    %cst_20 = arith.constant 5.000000e-01 : f32
    %23 = vector.broadcast %cst_20 : f32 to vector<1x32xf32>
    %24 = arith.addf %22, %23 : vector<1x32xf32>
    %25 = vector.extract_strided_slice %16 {offsets = [0, 32], sizes = [1, 32], strides = [1, 1]} : vector<1x128xf32> to vector<1x32xf32>
    %cst_21 = arith.constant 5.000000e-01 : f32
    %26 = vector.broadcast %cst_21 : f32 to vector<1x32xf32>
    %27 = arith.mulf %26, %25 : vector<1x32xf32>
    %28 = math.tanh %27 : vector<1x32xf32>
    %cst_22 = arith.constant 5.000000e-01 : f32
    %29 = vector.broadcast %cst_22 : f32 to vector<1x32xf32>
    %30 = arith.mulf %29, %28 : vector<1x32xf32>
    %cst_23 = arith.constant 5.000000e-01 : f32
    %31 = vector.broadcast %cst_23 : f32 to vector<1x32xf32>
    %32 = arith.addf %30, %31 : vector<1x32xf32>
    %33 = vector.extract_strided_slice %16 {offsets = [0, 64], sizes = [1, 32], strides = [1, 1]} : vector<1x128xf32> to vector<1x32xf32>
    %34 = vector.extract_strided_slice %16 {offsets = [0, 96], sizes = [1, 32], strides = [1, 1]} : vector<1x128xf32> to vector<1x32xf32>
    %35 = arith.mulf %24, %34 : vector<1x32xf32>
    %36 = arith.addf %33, %35 : vector<1x32xf32>
    %37 = math.tanh %36 : vector<1x32xf32>
    %38 = vector.extract_strided_slice %12 {offsets = [0, 0], sizes = [1, 32], strides = [1, 1]} : vector<1x64xf32> to vector<1x32xf32>
    %cst_24 = arith.constant 1.000000e+00 : f32
    %39 = vector.broadcast %cst_24 : f32 to vector<1x32xf32>
    %40 = arith.subf %39, %32 : vector<1x32xf32>
    %41 = arith.mulf %40, %37 : vector<1x32xf32>
    %42 = arith.mulf %32, %38 : vector<1x32xf32>
    %43 = arith.addf %41, %42 : vector<1x32xf32>
    %cst_25 = arith.constant dense<0.000000e+00> : vector<1x8xf32>
    %44 = tpu.matmul %43, %9, %cst_25 {dimension_numbers = #tpu.dot_dimension_numbers<[1], [1], [0], [0], [0, 0, 1, 0], [], []>} : vector<1x32xf32>, vector<8x32xf32>, vector<1x8xf32> -> vector<1x8xf32>
    %cst_26 = arith.constant dense<0xFF800000> : vector<1xf32>
    %45 = vector.multi_reduction <maximumf>, %44, %cst_26 [1] : vector<1x8xf32> to vector<1xf32>
    %46 = vector.shape_cast %45 : vector<1xf32> to vector<1x1xf32>
    %47 = vector.broadcast %46 : vector<1x1xf32> to vector<1x8xf32>
    %48 = arith.subf %44, %47 : vector<1x8xf32>
    %49 = math.exp %48 : vector<1x8xf32>
    %cst_27 = arith.constant dense<0.000000e+00> : vector<1xf32>
    %50 = vector.multi_reduction <add>, %49, %cst_27 [1] : vector<1x8xf32> to vector<1xf32>
    %51 = vector.shape_cast %50 : vector<1xf32> to vector<1x1xf32>
    %52 = vector.broadcast %51 : vector<1x1xf32> to vector<1x8xf32>
    %53 = arith.divf %49, %52 : vector<1x8xf32>
    %cst_28 = arith.constant dense<0.000000e+00> : vector<1x32xf32>
    %54 = tpu.matmul %53, %9, %cst_28 {dimension_numbers = #tpu.dot_dimension_numbers<[1], [0], [0], [1], [0, 0, 1, 1], [], []>} : vector<1x8xf32>, vector<8x32xf32>, vector<1x32xf32> -> vector<1x32xf32>
    %55 = tpu.concatenate %43, %54 in 1 : vector<1x32xf32>, vector<1x32xf32> -> vector<1x64xf32>
    %cst_29 = arith.constant dense<0.000000e+00> : vector<1x64xf32>
    %56 = tpu.matmul %55, %11, %cst_29 {dimension_numbers = #tpu.dot_dimension_numbers<[1], [0], [0], [1], [0, 0, 1, 1], [], []>} : vector<1x64xf32>, vector<64x64xf32>, vector<1x64xf32> -> vector<1x64xf32>
    %57 = arith.addf %56, %8 : vector<1x64xf32>
    %cst_30 = arith.constant dense<0xFF800000> : vector<1xf32>
    %58 = vector.multi_reduction <maximumf>, %57, %cst_30 [1] : vector<1x64xf32> to vector<1xf32>
    %59 = vector.shape_cast %58 : vector<1xf32> to vector<1x1xf32>
    %60 = vector.broadcast %59 : vector<1x1xf32> to vector<1x64xf32>
    %61 = arith.subf %57, %60 : vector<1x64xf32>
    %62 = math.exp %61 : vector<1x64xf32>
    %cst_31 = arith.constant dense<0.000000e+00> : vector<1xf32>
    %63 = vector.multi_reduction <add>, %62, %cst_31 [1] : vector<1x64xf32> to vector<1xf32>
    %64 = vector.shape_cast %63 : vector<1xf32> to vector<1x1xf32>
    %65 = math.log %64 : vector<1x1xf32>
    %66 = vector.broadcast %65 : vector<1x1xf32> to vector<1x64xf32>
    %67 = arith.subf %61, %66 : vector<1x64xf32>
    %cst_32 = arith.constant 0.000000e+00 : f32
    %68 = vector.broadcast %cst_32 : f32 to vector<1x120xf32>
    %69 = tpu.concatenate %67, %55, %53, %68 in 1 : vector<1x64xf32>, vector<1x64xf32>, vector<1x8xf32>, vector<1x120xf32> -> vector<1x256xf32>
    %70 = arith.index_cast %c0_i32 : i32 to index
    %c0_33 = arith.constant 0 : index
    %71 = vector.load %arg9[%70, %c0_33] : memref<1x256xf32, #tpu.memory_space<vmem>>, vector<1x256xf32>
    tpu.vector_store %arg9[%70, %c0_33], %69 {strides = array<i32>} : memref<1x256xf32, #tpu.memory_space<vmem>>, vector<1x256xf32>,
    %c1_i32 = arith.constant 1 : i32
    return
  }
  func.func @transform_0(%arg0: i32, %arg1: memref<1xi32, #tpu.memory_space<smem>>) -> (i32, i32) {
    %c0_i32 = arith.constant 0 : i32
    %c0_i32_0 = arith.constant 0 : i32
    %c0_i32_1 = arith.constant 0 : i32
    return %c0_i32, %c0_i32_0 : i32, i32
  }
  func.func @transform_1(%arg0: i32, %arg1: memref<1xi32, #tpu.memory_space<smem>>) -> (i32, i32) {
    %c0_i32 = arith.constant 0 : i32
    %c0_i32_0 = arith.constant 0 : i32
    %c0_i32_1 = arith.constant 0 : i32
    return %c0_i32, %c0_i32_0 : i32, i32
  }
  func.func @transform_2(%arg0: i32, %arg1: memref<1xi32, #tpu.memory_space<smem>>) -> (i32, i32) {
    %c0_i32 = arith.constant 0 : i32
    %c0_i32_0 = arith.constant 0 : i32
    %c0_i32_1 = arith.constant 0 : i32
    return %c0_i32, %c0_i32_0 : i32, i32
  }
  func.func @transform_3(%arg0: i32, %arg1: memref<1xi32, #tpu.memory_space<smem>>) -> (i32, i32) {
    %c0_i32 = arith.constant 0 : i32
    %c0_i32_0 = arith.constant 0 : i32
    %c0_i32_1 = arith.constant 0 : i32
    return %c0_i32, %c0_i32_0 : i32, i32
  }
  func.func @transform_4(%arg0: i32, %arg1: memref<1xi32, #tpu.memory_space<smem>>) -> (i32, i32) {
    %c0_i32 = arith.constant 0 : i32
    %c0_i32_0 = arith.constant 0 : i32
    %c0_i32_1 = arith.constant 0 : i32
    return %c0_i32, %c0_i32_0 : i32, i32
  }
  func.func @transform_5(%arg0: i32, %arg1: memref<1xi32, #tpu.memory_space<smem>>) -> (i32, i32) {
    %c0_i32 = arith.constant 0 : i32
    %c0_i32_0 = arith.constant 0 : i32
    %c0_i32_1 = arith.constant 0 : i32
    return %c0_i32, %c0_i32_0 : i32, i32
  }
  func.func @transform_6(%arg0: i32, %arg1: memref<1xi32, #tpu.memory_space<smem>>) -> (i32, i32) {
    %c0_i32 = arith.constant 0 : i32
    %c0_i32_0 = arith.constant 0 : i32
    %c0_i32_1 = arith.constant 0 : i32
    return %c0_i32, %c0_i32_0 : i32, i32
  }
  func.func @transform_7(%arg0: i32, %arg1: memref<1xi32, #tpu.memory_space<smem>>) -> (i32, i32) {
    %c0_i32 = arith.constant 0 : i32
    %c0_i32_0 = arith.constant 0 : i32
    %c0_i32_1 = arith.constant 0 : i32
    return %c0_i32, %c0_i32_0 : i32, i32
  }
}

</mosaic_0001>

<bundles_post_ra>
// kernel: tpu_custom_call.1
= control target key start
LH: loop header
LB: loop body
LE: loop exit
PB: predicated region body
PF: predicated region fallthrough
CT: control target
= control target key end

     0   :  { %14 = vsyncpa [#allocation6], 0  ;;  %s550_s0 = inlined_call_operand.<no memory space> [shape: s32[1], index: 0, kind: input, shape index: {}]   ;;  %s551_s1 = inlined_call_operand.vmem [shape: f32[64,32], index: 1, kind: input, shape index: {}]   ;;  %s552_s2 = inlined_call_operand.vmem [shape: f32[1,64], index: 2, kind: input, shape index: {}]   ;;  %s553_s3 = inlined_call_operand.hbm [shape: f32[8,32], index: 3, kind: input, shape index: {}]   ;;  %s554_s4 = inlined_call_operand.vmem [shape: f32[32,128], index: 4, kind: input, shape index: {}]   ;;  %s555_s5 = inlined_call_operand.vmem [shape: f32[64,128], index: 5, kind: input, shape index: {}]   ;;  %s556_s6 = inlined_call_operand.hbm [shape: f32[64,64], index: 6, kind: input, shape index: {}]   ;;  %s557_s7 = inlined_call_operand.vmem [shape: f32[2,128], index: 7, kind: input, shape index: {}]   ;;  %s558_s8 = inlined_call_operand.hbm [shape: f32[1,256], index: 8, kind: output, shape index: {}]  }
   0x1   :  { %15 = vsyncpa [#allocation9], 0 }
   0x2   :  { %16 = vsyncpa [#allocation7], 0  ;;  %s26_s29 = sshll.u32 %s553_s3, 4  ;;  %s422_s30 = smov [#allocation5]   ;;  %s27_s29 = int_to_ptr.hbm [resolvable:$true] %s26_s29 }
   0x3   :  { %s28_s9 = sshll.u32 %s422_s30, 4  ;;  %s40_s12 = sshll.u32 %s556_s6, 4  ;;  %s29_s9 = int_to_ptr.vmem [resolvable:$true] %s28_s9  ;;  %s41_s12 = int_to_ptr.hbm [resolvable:$true] %s40_s12 }
   0x4   :  { %31 = dma.hbm_to_vmem [thread:$0]  %s27_s29, 128, %s29_s9, [#allocation6]  }
   0x5   :  { %s423_s13 = smov [#allocation8]   ;;  %s424_s15 = smov 128  }
   0x6   :  { %s42_s14 = sshll.u32 %s423_s13, 4  ;;  %s425_s16 = smov 8   ;;  %s43_s14 = int_to_ptr.vmem [resolvable:$true] %s42_s14 }
   0x7   :  { %48 = dma.hbm_to_vmem [thread:$0]  %s41_s12, 1024, %s43_s14, [#allocation9], %s424_s15, %s424_s15, %s425_s16  }
   0x8   :  { %416 = dma.done.wait [#allocation6], 128  }
   0x9   :  { %417 = vsyncadd [#allocation6], 4294967168 }
   0xa   :  { %418 = dma.done.wait [#allocation9], 1024  }
   0xb   :  { %419 = vsyncadd [#allocation9], 4294966272  ;;  %v66_v0 = vld [vmem:[%s554_s4 + $0x18] sm:$0xff]  ;;  %v65_v1 = vld [vmem:[%s554_s4 + $0x10] sm:$0xff]  ;;  %s60_s9 = scalar_lea.vmem %s551_s1, %s550_s0  ;;  %vm67_vm0 = vcmask 261120   ;;  %vm112_vm1 = vcmask 523264  }
   0xc   :  { %v101_v2 = vld [vmem:[%s555_s5 + $0x38] sm:$0xff]  ;;  %83 = vmatpush.msra.mxu0 %v66_v0  ;;  %v100_v3 = vld [vmem:[%s555_s5 + $0x30] sm:$0xff]  ;;  %v64_v4 = vld [vmem:[%s554_s4 + $0x8] sm:$0xff]  ;;  %s427_s21 = smov 64   ;;  %s428_s22 = smov 96   ;;  %vm191_vm2 = vcmask 57344  }
   0xd   :  { %124 = vmatpush.msra.mxu1 %v101_v2  ;;  %v99_v5 = vld [vmem:[%s555_s5 + $0x28] sm:$0xff]  ;;  %v63_v6 = vld [vmem:[%s554_s4] sm:$0xff]  ;;  %v97_v9 = vld [vmem:[%s555_s5 + $0x18] sm:$0xff]  ;;  %vm216_vm7 = vcmask 64512   ;;  %vm269_vm8 = vcmask 516096   ;;  %s305_s29 = sshll.u32 %s558_s8, 4  ;;  %s306_s29 = int_to_ptr.hbm [resolvable:$true] %s305_s29 }
   0xe   :  { %84 = vmatpush.msra.mxu0 %v65_v1  ;;  %v98_v7 = vld [vmem:[%s555_s5 + $0x20] sm:$0xff]  ;;  %v96_v10 = vld [vmem:[%s555_s5 + $0x10] sm:$0xff]  ;;  %v95_v11 = vld [vmem:[%s555_s5 + $0x8] sm:$0xff]  ;;  %vm290_vm9 = vcmask 1040384  }
   0xf   :  { %125 = vmatpush.msra.mxu1 %v100_v3  ;;  %v61_v8 = vld [vmem:[%s60_s9] sm:$0x1]  ;;  %v93_v30 = vld [vmem:[#allocation5] sm:$0xff]  ;;  %v107_v60 = vld [vmem:[#allocation8 + $0x28] sm:$0xff] }
  0x10   :  { %85 = vmatpush.msra.mxu0 %v64_v4  ;;  %v94_v12 = vld [vmem:[%s555_s5] sm:$0xff]  ;;  %s426_s5 = smov 32   ;;  %319 = vmatpush.xpose.msk.msra.mxu2 %vm67_vm0, %v93_v30  ;;  %v106_v61 = vld [vmem:[#allocation8 + $0x20] sm:$0xff]  ;;  %v103_v0 = vld [vmem:[#allocation8 + $0x8] sm:$0xff] }
  0x11   :  { %126 = vmatpush.msra.mxu1 %v99_v5  ;;  %v110_v13 = vld [vmem:[%s552_s2] sm:$0x1]  ;;  %v109_v58 = vld [vmem:[#allocation8 + $0x38] sm:$0xff]  ;;  %v102_v2 = vld [vmem:[#allocation8] sm:$0xff] }
  0x12   :  { %86 = vmatpush.msra.mxu0 %v63_v6  ;;  %v62_v14 = vld [vmem:[%s557_s7] sm:$0x1]  ;;  %257 = vmatpush.msra.mxu3 %v109_v58  ;;  %v105_v62 = vld [vmem:[#allocation8 + $0x18] sm:$0xff] }
  0x13   :  { %127 = vmatpush.msra.mxu1 %v98_v7  ;;  %317 = vmatmul.msk.f32.vlgmr.msra.gmra.mxu0 %vm67_vm0, %v61_v8  ;;  %v331_v29 = vld [vmem:[%s552_s2] ss:$0 sm:$0xff]  ;;  %v92_v5 = vld [vmem:[%s557_s7 + $0x1] sm:$0x1]  ;;  %s429_s7 = smov [#allocation10]  }
  0x14   :  { %235 = vmatpush.msrb.mxu2 %v93_v30  ;;  %v108_v59 = vld [vmem:[#allocation8 + $0x30] sm:$0xff]  ;;  %s303_s26 = sshll.u32 %s429_s7, 4  ;;  %s304_s26 = int_to_ptr.vmem [resolvable:$true] %s303_s26 }
  0x15   :  { %128 = vmatpush.msra.mxu1 %v97_v9  ;;  %258 = vmatpush.msra.mxu3 %v108_v59  ;;  %v104_v63 = vld [vmem:[#allocation8 + $0x10] sm:$0xff] }
  0x17   :  { %129 = vmatpush.msra.mxu1 %v96_v10  ;;  %259 = vmatpush.msra.mxu3 %v107_v60 }
  0x19   :  { %130 = vmatpush.msra.mxu1 %v95_v11  ;;  %260 = vmatpush.msra.mxu3 %v106_v61 }
  0x1b   :  { %131 = vmatpush.msra.mxu1 %v94_v12  ;;  %261 = vmatpush.msra.mxu3 %v105_v62 }
  0x1c   :  { %318 = vmatmul.msk.f32.vlgmr.msra.gmra.mxu1 %vm112_vm1, %v110_v13 }
  0x1d   :  { %262 = vmatpush.msra.mxu3 %v104_v63 }
  0x1f   :  { %263 = vmatpush.msra.mxu3 %v103_v0 }
  0x21   :  { %264 = vmatpush.msra.mxu3 %v102_v2 }
  0x90   :  { %v88_v15 = vpop.f32.mrf.mxu0 }
  0x91   :  { %v89_v16 = vadd.f32 %v88_v15, %v62_v14 }
  0x93   :  { %91 = vst [vmem:[#allocation2] sm:$0x1] %v89_v16  ;;  %v293_v16 = vlaneseq }
  0x95   :  { %vm295_vm10 = vcmp.lt.s32.totalorder %v293_v16, 256 }
  0x99   :  { %v133_v17 = vpop.f32.mrf.mxu1 }
  0x9a   :  { %v111_v18 = vld [vmem:[#allocation2] sm:$0x1] }
  0x9b   :  { %v134_v19 = vadd.f32 %v133_v17, %v111_v18 }
  0x9d   :  { %141 = vrot.lane.b32.xlu0 %v134_v19, %s426_s5  ;;  %v136_v20 = vmul.f32 0.5, %v134_v19 }
  0x9f   :  { %332 = vtanh.f32 %v136_v20 }
  0xa5   :  { %v333_v21 = vpop.eup %332 }
  0xa6   :  { %v138_v22 = vmul.f32 0.5, %v333_v21 }
  0xa8   :  { %v139_v23 = vadd.f32 0.5, %v138_v22 }
  0xaa   :  { %v151_v32 = vsub.f32 1.0, %v139_v23 }
 0x10f   :  { %v142_v24 = vpop.permute.xlu0 %141 }
 0x110   :  { %v144_v25 = vmul.f32 %v142_v24, %v139_v23 }
 0x112   :  { %146 = vrot.lane.b32.xlu0 %v144_v25, %s427_s21 }
 0x184   :  { %v147_v26 = vpop.permute.xlu0 %146 }
 0x185   :  { %v149_v27 = vadd.f32 %v147_v26, %v134_v19 }
 0x187   :  { %334 = vtanh.f32 %v149_v27 }
 0x18d   :  { %v335_v28 = vpop.eup %334 }
 0x18e   :  { %153 = vrot.lane.b32.xlu1 %v335_v28, %s428_s22 }
 0x196   :  { %158 = vrot.lane.b32.xlu1 %v331_v29, %s426_s5 }
 0x200   :  { %v154_v31 = vpop.permute.xlu1 %153 }
 0x201   :  { %v156_v34 = vmul.f32 %v154_v31, %v151_v32 }
 0x208   :  { %v159_v33 = vpop.permute.xlu1 %158 }
 0x209   :  { %v161_v35 = vmul.f32 %v159_v33, %v139_v23 }
 0x20b   :  { %v162_v36 = vadd.f32 %v161_v35, %v156_v34 }
 0x20d   :  { %164 = vrot.lane.b32.xlu2 %v162_v36, %s428_s22 }
 0x267   :  { %v165_v37 = vpop.permute.xlu2 %164 }
 0x268   :  { %320 = vmatmul.msk.f32.vlgmr.msra.gmra.mxu2 %vm67_vm0, %v165_v37 }
 0x2eb   :  { %v188_v38 = vpop.f32.mrf.mxu2 }
 0x2ec   :  { %v192_v39 = vsel %vm191_vm2, %v188_v38, -inf }
 0x2ed   :  { %193 = vmax.xlane.f32.xlu2 %v192_v39 }
 0x360   :  { %v194_v40 = vpop.xlane.xlu2 %193 }
 0x361   :  { %v195_v41 = vsub.f32 %v188_v38, %v194_v40 }
 0x363   :  { %v196_v42 = vmul.f32 1.442695, %v195_v41 }
 0x365   :  { %336 = vpow2.f32 %v196_v42 }
 0x36b   :  { %v337_v43 = vpop.eup %336 }
 0x36c   :  { %v198_v44 = vsel %vm191_vm2, %v337_v43, 0.0 }
 0x36d   :  { %199 = vadd.xlane.f32.xlu0 %v198_v44 }
 0x3e0   :  { %v200_v45 = vpop.xlane.xlu0 %199 }
 0x3e1   :  { %338 = vrcp.f32 %v200_v45  ;;  %v212_v49 = vand.u32 2147483648, %v200_v45  ;;  %v210_v51 = vand.u32 2147483647, %v200_v45  ;;  %vm206_vm4 = vweird.f32 %v200_v45 }
 0x3e3   :  { %v213_v53 = vor.u32 1.1754944e-38, %v212_v49  ;;  %vm211_vm6 = vcmp.eq.f32.partialorder %v210_v51, 8.507059e+37 }
 0x3e7   :  { %v339_v46 = vpop.eup %338 }
 0x3e8   :  { %v202_v47 = vmul.f32 %v339_v46, %v200_v45  ;;  %vm207_vm3 = vweird.f32 %v339_v46 }
 0x3e9   :  { %vm208_vm5 = vmor %vm206_vm4, %vm207_vm3 }
 0x3ea   :  { %v203_v48 = vsub.f32 1.0, %v202_v47 }
 0x3ec   :  { %v204_v50 = vmul.f32 %v339_v46, %v203_v48 }
 0x3ee   :  { %v205_v52 = vadd.f32 %v339_v46, %v204_v50 }
 0x3f0   :  { %v209_v54 = vsel %vm208_vm5, %v339_v46, %v205_v52 }
 0x3f1   :  { %v214_v55 = vsel %vm211_vm6, %v213_v53, %v209_v54 }
 0x3f2   :  { %v215_v56 = vmul.f32 %v337_v43, %v214_v55 }
 0x3f4   :  { %321 = vmatmul.msk.f32.vlgmr.msrb.gmra.mxu2 %vm216_vm7, %v215_v56  ;;  %v286_v57 = vsel %vm216_vm7, %v215_v56, 0.0 }
 0x3f5   :  { %v289_v19 = vrot.slane %v286_v57, 7 }
 0x477   :  { %v237_v1 = vpop.f32.mrf.mxu2 }
 0x478   :  { %242 = vrot.lane.b32.xlu1 %v237_v1, %s426_s5 }
 0x4ea   :  { %v243_v3 = vpop.permute.xlu1 %242 }
 0x4eb   :  { %v245_v4 = vsel %vm67_vm0, %v165_v37, %v243_v3 }
 0x4ec   :  { %322 = vmatmul.msk.f32.vlgmr.msra.gmra.mxu3 %vm112_vm1, %v245_v4 }
 0x56f   :  { %v266_v6 = vpop.f32.mrf.mxu3 }
 0x570   :  { %v267_v7 = vadd.f32 %v266_v6, %v92_v5 }
 0x572   :  { %v270_v8 = vsel %vm269_vm8, %v267_v7, -inf }
 0x573   :  { %271 = vmax.xlane.f32.xlu1 %v270_v8 }
 0x5e6   :  { %v272_v9 = vpop.xlane.xlu1 %271 }
 0x5e7   :  { %v273_v10 = vsub.f32 %v267_v7, %v272_v9 }
 0x5e9   :  { %v274_v11 = vmul.f32 1.442695, %v273_v10 }
 0x5eb   :  { %340 = vpow2.f32 %v274_v11 }
 0x5f1   :  { %v341_v12 = vpop.eup %340 }
 0x5f2   :  { %v276_v13 = vsel %vm269_vm8, %v341_v12, 0.0 }
 0x5f3   :  { %277 = vadd.xlane.f32.xlu2 %v276_v13 }
 0x60b   :  { %282 = vrot.lane.b32.xlu2 %v245_v4, %s427_s21 }
 0x666   :  { %v278_v14 = vpop.xlane.xlu2 %277 }
 0x667   :  { %342 = vlog2.f32 %v278_v14 }
 0x66d   :  { %v343_v15 = vpop.eup %342 }
 0x66e   :  { %v280_v17 = vmul.f32 0.6931472, %v343_v15  ;;  %v283_v20 = vpop.permute.xlu2 %282 }
 0x670   :  { %v281_v18 = vsub.f32 %v273_v10, %v280_v17 }
 0x672   :  { %v285_v21 = vsel %vm112_vm1, %v281_v18, %v283_v20 }
 0x673   :  { %v291_v22 = vsel %vm290_vm9, %v285_v21, %v289_v19 }
 0x674   :  { %297 = vst.msk [vmem:[#allocation10] sm:$0x3] %vm295_vm10, %v291_v22 }
 0x675   :  { %308 = dma.vmem_to_hbm [thread:$0]  %s304_s26, 32, %s306_s29, [#allocation7]  }
 0x676   :  { %420 = dma.done.wait [#allocation7], 32  }
 0x677   :  { %421 = vsyncadd [#allocation7], 4294967264 }
 0x678   :  { %313 = vsyncpa [#allocation6], 1 }
 0x679   :  { %314 = vsyncpa [#allocation9], 1 }
 0x67a   :  { %315 = vsyncpa [#allocation7], 1 }

</bundles_post_ra>
